<compile_context>
chip_gen: v6e
topology: v6e:2x2x1
jax: 0.10.0
libtpu: 0.0.40
codegen_flags: <defaults>
</compile_context>

<pallas_src>
import functools

import jax
import jax.numpy as jnp
from jax import lax
from jax.experimental import pallas as pl
from jax.experimental.pallas import tpu as pltpu


def _round_up(x, m):
    return ((x + m - 1) // m) * m


def _corn_loss_kernel(logits_ref, y_ref, out_ref, loss_acc, cnt_acc, *,
                      num_classes, pack, tile_cols, valid_cols, inner_steps):
    """One (K-1)*pack x tile_cols logits tile + (pack, tile_cols) label tile.

    loss_acc / cnt_acc: VMEM f32 (pack, tile_cols) vector accumulators that
    persist across the inner ("arbitrary") grid axis of the current chunk.
    """
    km1 = num_classes - 1
    c = pl.program_id(0)          # outer chunk (parallel)
    s = pl.program_id(1)          # inner step (arbitrary / reduction)

    @pl.when(s == 0)
    def _init():
        loss_acc[...] = jnp.zeros_like(loss_acc)
        cnt_acc[...] = jnp.zeros_like(cnt_acc)

    # Intended (unclamped) tile index.  Overhang steps (whose DMA index was
    # clamped in the index_map) and ragged tail columns are fully masked out
    # by the column-validity test below, so stale/garbage VMEM never counts.
    t_idx = c * inner_steps + s
    col = t_idx * tile_cols + lax.broadcasted_iota(
        jnp.int32, (pack, tile_cols), 1)
    valid = col < valid_cols

    y = jnp.where(valid, y_ref[...], -1)          # (pack, tile_cols) int32

    # Participation count: example with label y joins min(y+1, K-1) tasks;
    # y = -1 (padding / invalid) contributes 0.
    cnt_acc[...] += jnp.clip(y + 1, 0, km1).astype(jnp.float32)

    # loss_sum = sum_t [ sum_{y>=t} -logsigmoid(x_t)  +  sum_{y==t} x_t ]
    loss_tile = jnp.zeros((pack, tile_cols), jnp.float32)
    for t in range(km1):                          # small static unroll
        x_t = logits_ref[pl.ds(t * pack, pack), :].astype(jnp.float32)
        # Numerically stable log-sigmoid: min(x, 0) - log1p(exp(-|x|))
        logsig = jnp.minimum(x_t, 0.0) - jnp.log1p(jnp.exp(-jnp.abs(x_t)))
        loss_tile = (loss_tile
                     + jnp.where(y >= t, -logsig, 0.0)
                     + jnp.where(y == t, x_t, 0.0))
    loss_acc[...] += loss_tile

    @pl.when(s == pl.num_programs(1) - 1)
    def _finalize():
        out_ref[0, 0] = jnp.sum(loss_acc[...])
        out_ref[0, 1] = jnp.sum(cnt_acc[...])


def corn_loss_pallas(logits, y_train, num_classes, *,
                     target_block_bytes=2 * 1024 * 1024,
                     max_block_cols=65536,
                     num_chunks=2):
    """logits: (N, num_classes-1), y_train: (N,) int -> scalar f32 loss."""
    n, km1 = logits.shape
    assert km1 == num_classes - 1

    itemsize = jnp.dtype(logits.dtype).itemsize
    pack = 32 // itemsize                     # 8 for f32, 16 for bf16

    n_pad = _round_up(n, pack)                # tiny (< pack) tail pad
    ncols = n_pad // pack                     # packed example-column count
    ncols_pad = _round_up(max(ncols, 1), 128)  # lane alignment

    # Sublane-packed, lane-dense layout: (N, K-1) -> ((K-1)*pack, ncols_pad).
    # TODO(synk): have the upstream CORN linear emit logits as (K-1, N) (or in
    # this packed layout) directly; then this transpose copy disappears.  The
    # transpose + tiny alignment pads below fuse into a single XLA copy pass.
    lt = jnp.transpose(logits)                                  # (K-1, N)
    lt = jnp.pad(lt, ((0, 0), (0, n_pad - n)))                  # < pack cols
    logits_packed = lt.reshape(km1 * pack, ncols)
    logits_packed = jnp.pad(logits_packed,
                            ((0, 0), (0, ncols_pad - ncols)))

    y = y_train.astype(jnp.int32)
    y = jnp.pad(y, (0, n_pad - n), constant_values=-1)
    y_packed = y.reshape(pack, ncols)
    y_packed = jnp.pad(y_packed, ((0, 0), (0, ncols_pad - ncols)),
                       constant_values=-1)

    # Adaptive lane-tile width: ~target_block_bytes of logits per grid step.
    block_cols = target_block_bytes // (km1 * pack * itemsize)
    block_cols = min(block_cols, max_block_cols, ncols_pad)
    block_cols = max(128, (block_cols // 128) * 128)

    n_tiles = (ncols_pad + block_cols - 1) // block_cols
    chunks = max(1, min(num_chunks, n_tiles))
    inner = (n_tiles + chunks - 1) // chunks
    chunks = (n_tiles + inner - 1) // inner
    last_tile = n_tiles - 1

    def col_index(ci, si):
        # Clamp so overhang steps re-read the last valid tile (their
        # contribution is zeroed in-kernel by the column-validity mask).
        return (0, jnp.minimum(ci * inner + si, last_tile))

    kernel = functools.partial(
        _corn_loss_kernel, num_classes=num_classes, pack=pack,
        tile_cols=block_cols, valid_cols=ncols, inner_steps=inner)

    partials = pl.pallas_call(
        kernel,
        out_shape=jax.ShapeDtypeStruct((chunks, 2), jnp.float32),
        grid_spec=pltpu.PrefetchScalarGridSpec(
            num_scalar_prefetch=0,
            grid=(chunks, inner),
            in_specs=[
                pl.BlockSpec((km1 * pack, block_cols), col_index),
                pl.BlockSpec((pack, block_cols), col_index),
            ],
            out_specs=pl.BlockSpec((1, 2), lambda ci, si: (ci, 0),
                                   memory_space=pltpu.MemorySpace.SMEM),
            scratch_shapes=[
                pltpu.VMEM((pack, block_cols), jnp.float32),   # loss partials
                pltpu.VMEM((pack, block_cols), jnp.float32),   # count partials
            ],
        ),
        compiler_params=pltpu.CompilerParams(
            dimension_semantics=("parallel", "arbitrary"),
            vmem_limit_bytes=32 * 1024 * 1024,
        ),
    )(logits_packed, y_packed)

    loss_sum = jnp.sum(partials[:, 0])
    count = jnp.sum(partials[:, 1])
    # Note: count == 0 (empty batch) yields inf/NaN, matching the reference.
    return loss_sum / count


def _corn_loss_ref(logits, y_train, num_classes):
    """Pure-JAX reference mirroring the PyTorch loop-based implementation."""
    km1 = num_classes - 1
    col = jnp.arange(km1)[None, :]
    y = y_train.astype(jnp.int32)[:, None]
    mask = y >= col
    label = (y > col).astype(jnp.float32)
    x = logits.astype(jnp.float32)
    logsig = jax.nn.log_sigmoid(x)
    per = logsig * label + (logsig - x) * (1.0 - label)
    loss_sum = -jnp.sum(jnp.where(mask, per, 0.0))
    return loss_sum / jnp.sum(mask.astype(jnp.float32))


if __name__ == "__main__":
    NUM_CLASSES = 5
    FEATURES = 32

    key = jax.random.PRNGKey(0)
    k_x, k_w, k_b, k_l2, k_y2, k_l3, k_y3 = jax.random.split(key, 7)

    # 1) Canonical small case (8 examples) a la the coral_pytorch docstring:
    #    deterministic synthetic CORN layer Linear(FEATURES, NUM_CLASSES-1).
    x = jax.random.normal(k_x, (8, FEATURES), dtype=jnp.float32)
    w = jax.random.normal(k_w, (FEATURES, NUM_CLASSES - 1), dtype=jnp.float32) * 0.1
    b = jax.random.normal(k_b, (NUM_CLASSES - 1,), dtype=jnp.float32) * 0.1
    logits = x @ w + b                                   # (8, 4)
    y_train = jnp.array([0, 1, 2, 2, 2, 3, 4, 4], dtype=jnp.int32)
    loss = corn_loss_pallas(logits, y_train, NUM_CLASSES)
    jax.block_until_ready(loss)
    ref = _corn_loss_ref(logits, y_train, NUM_CLASSES)
    assert jnp.allclose(loss, ref, rtol=1e-5, atol=1e-6), (loss, ref)

    # 2) N=300 with default params (packing-tail label padding path).
    logits2 = jax.random.normal(k_l2, (300, NUM_CLASSES - 1), dtype=jnp.float32)
    y2 = jax.random.randint(k_y2, (300,), 0, NUM_CLASSES, dtype=jnp.int32)
    loss2 = corn_loss_pallas(logits2, y2, NUM_CLASSES)
    ref2 = _corn_loss_ref(logits2, y2, NUM_CLASSES)
    assert jnp.allclose(loss2, ref2, rtol=1e-5, atol=1e-6), (loss2, ref2)

    # 3) Multi-tile / multi-chunk / ragged-tail stress: grid = (2, 2) with one
    #    clamped overhang step and a ragged last lane-block (no logits pad).
    logits3 = jax.random.normal(k_l3, (5000, NUM_CLASSES - 1), dtype=jnp.float32)
    y3 = jax.random.randint(k_y3, (5000,), 0, NUM_CLASSES, dtype=jnp.int32)
    loss3 = corn_loss_pallas(logits3, y3, NUM_CLASSES,
                             max_block_cols=256, num_chunks=2)
    ref3 = _corn_loss_ref(logits3, y3, NUM_CLASSES)
    assert jnp.allclose(loss3, ref3, rtol=1e-4, atol=1e-6), (loss3, ref3)

    # 4) bf16 logits exercise the 16-row sublane-packing path.
    logits4 = logits3[:1000].astype(jnp.bfloat16)
    y4 = y3[:1000]
    loss4 = corn_loss_pallas(logits4, y4, NUM_CLASSES)
    ref4 = _corn_loss_ref(logits4, y4, NUM_CLASSES)
    assert jnp.allclose(loss4, ref4, rtol=2e-3, atol=1e-4), (loss4, ref4)

    jax.block_until_ready((loss, loss2, loss3, loss4))
    print("KERNEL_OK")
</pallas_src>

<mosaic_0001>
module attributes {stable_mosaic.version = 11 : i64} {
  func.func @_corn_loss_kernel(%arg0: i32, %arg1: i32, %arg2: memref<32x128xf32, #tpu.memory_space<vmem>>, %arg3: memref<8x128xi32, #tpu.memory_space<vmem>>, %arg4: memref<1x2xf32, #tpu.memory_space<smem>>, %arg5: memref<8x128xf32, #tpu.memory_space<vmem>>, %arg6: memref<8x128xf32, #tpu.memory_space<vmem>>) attributes {dimension_semantics = [#tpu.dimension_semantics<parallel>, #tpu.dimension_semantics<arbitrary>], iteration_bounds = array<i64: 1, 1>, scalar_prefetch = 0 : i64, scratch_operands = 2 : i64, tpu.core_type = #tpu.core_type<tc>, window_params = [{transform_indices = @transform_0, window_bounds = array<i64: 32, 128>}, {transform_indices = @transform_1, window_bounds = array<i64: 8, 128>}, {transform_indices = @transform_2, window_bounds = array<i64: 1, 2>}]} {
    %c0_i32 = arith.constant 0 : i32
    %0 = arith.cmpi eq, %arg1, %c0_i32 : i32
    %1 = arith.extui %0 : i1 to i32
    %c0_i32_0 = arith.constant 0 : i32
    %2 = arith.cmpi ne, %1, %c0_i32_0 : i32
    scf.if %2 {
      %cst_46 = arith.constant 0.000000e+00 : f32
      %115 = vector.broadcast %cst_46 : f32 to vector<8x128xf32>
      %c0_47 = arith.constant 0 : index
      %c0_48 = arith.constant 0 : index
      %116 = vector.load %arg5[%c0_47, %c0_48] : memref<8x128xf32, #tpu.memory_space<vmem>>, vector<8x128xf32>
      tpu.vector_store %arg5[%c0_47, %c0_48], %115 {strides = array<i32>} : memref<8x128xf32, #tpu.memory_space<vmem>>, vector<8x128xf32>,
      %cst_49 = arith.constant 0.000000e+00 : f32
      %117 = vector.broadcast %cst_49 : f32 to vector<8x128xf32>
      %c0_50 = arith.constant 0 : index
      %c0_51 = arith.constant 0 : index
      %118 = vector.load %arg6[%c0_50, %c0_51] : memref<8x128xf32, #tpu.memory_space<vmem>>, vector<8x128xf32>
      tpu.vector_store %arg6[%c0_50, %c0_51], %117 {strides = array<i32>} : memref<8x128xf32, #tpu.memory_space<vmem>>, vector<8x128xf32>,
    } else {
    }
    %c1_i32 = arith.constant 1 : i32
    %3 = arith.muli %arg0, %c1_i32 : i32
    %4 = arith.addi %3, %arg1 : i32
    %c128_i32 = arith.constant 128 : i32
    %5 = arith.muli %4, %c128_i32 : i32
    %6 = tpu.iota {dimensions = array<i32: 1>} : vector<8x128xi32>
    %7 = vector.broadcast %5 : i32 to vector<8x128xi32>
    %8 = arith.addi %7, %6 : vector<8x128xi32>
    %c1_i32_1 = arith.constant 1 : i32
    %9 = vector.broadcast %c1_i32_1 : i32 to vector<8x128xi32>
    %10 = arith.cmpi slt, %8, %9 : vector<8x128xi32>
    %c0 = arith.constant 0 : index
    %c0_2 = arith.constant 0 : index
    %11 = vector.load %arg3[%c0, %c0_2] : memref<8x128xi32, #tpu.memory_space<vmem>>, vector<8x128xi32>
    %c-1_i32 = arith.constant -1 : i32
    %12 = vector.broadcast %c-1_i32 : i32 to vector<8x128xi32>
    %13 = arith.select %10, %11, %12 : vector<8x128xi1>, vector<8x128xi32>
    %c0_3 = arith.constant 0 : index
    %c0_4 = arith.constant 0 : index
    %14 = vector.load %arg6[%c0_3, %c0_4] : memref<8x128xf32, #tpu.memory_space<vmem>>, vector<8x128xf32>
    %c1_i32_5 = arith.constant 1 : i32
    %15 = vector.broadcast %c1_i32_5 : i32 to vector<8x128xi32>
    %16 = arith.addi %13, %15 : vector<8x128xi32>
    %c0_i32_6 = arith.constant 0 : i32
    %c4_i32 = arith.constant 4 : i32
    %17 = vector.broadcast %c0_i32_6 : i32 to vector<8x128xi32>
    %18 = arith.maxsi %17, %16 : vector<8x128xi32>
    %19 = vector.broadcast %c4_i32 : i32 to vector<8x128xi32>
    %20 = arith.minsi %19, %18 : vector<8x128xi32>
    %21 = arith.sitofp %20 : vector<8x128xi32> to vector<8x128xf32>
    %22 = arith.addf %14, %21 : vector<8x128xf32>
    %c0_7 = arith.constant 0 : index
    %c0_8 = arith.constant 0 : index
    %23 = vector.load %arg6[%c0_7, %c0_8] : memref<8x128xf32, #tpu.memory_space<vmem>>, vector<8x128xf32>
    tpu.vector_store %arg6[%c0_7, %c0_8], %22 {strides = array<i32>} : memref<8x128xf32, #tpu.memory_space<vmem>>, vector<8x128xf32>,
    %cst = arith.constant 0.000000e+00 : f32
    %24 = vector.broadcast %cst : f32 to vector<8x128xf32>
    %c0_9 = arith.constant 0 : index
    %c0_10 = arith.constant 0 : index
    %25 = vector.load %arg2[%c0_9, %c0_10] : memref<32x128xf32, #tpu.memory_space<vmem>>, vector<8x128xf32>
    %cst_11 = arith.constant 0.000000e+00 : f32
    %26 = vector.broadcast %cst_11 : f32 to vector<8x128xf32>
    %27 = arith.minimumf %25, %26 : vector<8x128xf32>
    %28 = math.absf %25 : vector<8x128xf32>
    %cst_12 = arith.constant 0.000000e+00 : f32
    %29 = vector.broadcast %cst_12 : f32 to vector<8x128xf32>
    %30 = arith.subf %29, %28 : vector<8x128xf32>
    %31 = math.exp %30 : vector<8x128xf32>
    %32 = math.log1p %31 : vector<8x128xf32>
    %33 = arith.subf %27, %32 : vector<8x128xf32>
    %c0_i32_13 = arith.constant 0 : i32
    %34 = vector.broadcast %c0_i32_13 : i32 to vector<8x128xi32>
    %35 = arith.cmpi sge, %13, %34 : vector<8x128xi32>
    %cst_14 = arith.constant 0.000000e+00 : f32
    %36 = vector.broadcast %cst_14 : f32 to vector<8x128xf32>
    %37 = arith.subf %36, %33 : vector<8x128xf32>
    %cst_15 = arith.constant 0.000000e+00 : f32
    %38 = vector.broadcast %cst_15 : f32 to vector<8x128xf32>
    %39 = arith.select %35, %37, %38 : vector<8x128xi1>, vector<8x128xf32>
    %40 = arith.addf %24, %39 : vector<8x128xf32>
    %c0_i32_16 = arith.constant 0 : i32
    %41 = vector.broadcast %c0_i32_16 : i32 to vector<8x128xi32>
    %42 = arith.cmpi eq, %13, %41 : vector<8x128xi32>
    %cst_17 = arith.constant 0.000000e+00 : f32
    %43 = vector.broadcast %cst_17 : f32 to vector<8x128xf32>
    %44 = arith.select %42, %25, %43 : vector<8x128xi1>, vector<8x128xf32>
    %45 = arith.addf %40, %44 : vector<8x128xf32>
    %c8 = arith.constant 8 : index
    %c0_18 = arith.constant 0 : index
    %46 = vector.load %arg2[%c8, %c0_18] : memref<32x128xf32, #tpu.memory_space<vmem>>, vector<8x128xf32>
    %cst_19 = arith.constant 0.000000e+00 : f32
    %47 = vector.broadcast %cst_19 : f32 to vector<8x128xf32>
    %48 = arith.minimumf %46, %47 : vector<8x128xf32>
    %49 = math.absf %46 : vector<8x128xf32>
    %cst_20 = arith.constant 0.000000e+00 : f32
    %50 = vector.broadcast %cst_20 : f32 to vector<8x128xf32>
    %51 = arith.subf %50, %49 : vector<8x128xf32>
    %52 = math.exp %51 : vector<8x128xf32>
    %53 = math.log1p %52 : vector<8x128xf32>
    %54 = arith.subf %48, %53 : vector<8x128xf32>
    %c1_i32_21 = arith.constant 1 : i32
    %55 = vector.broadcast %c1_i32_21 : i32 to vector<8x128xi32>
    %56 = arith.cmpi sge, %13, %55 : vector<8x128xi32>
    %cst_22 = arith.constant 0.000000e+00 : f32
    %57 = vector.broadcast %cst_22 : f32 to vector<8x128xf32>
    %58 = arith.subf %57, %54 : vector<8x128xf32>
    %cst_23 = arith.constant 0.000000e+00 : f32
    %59 = vector.broadcast %cst_23 : f32 to vector<8x128xf32>
    %60 = arith.select %56, %58, %59 : vector<8x128xi1>, vector<8x128xf32>
    %61 = arith.addf %45, %60 : vector<8x128xf32>
    %c1_i32_24 = arith.constant 1 : i32
    %62 = vector.broadcast %c1_i32_24 : i32 to vector<8x128xi32>
    %63 = arith.cmpi eq, %13, %62 : vector<8x128xi32>
    %cst_25 = arith.constant 0.000000e+00 : f32
    %64 = vector.broadcast %cst_25 : f32 to vector<8x128xf32>
    %65 = arith.select %63, %46, %64 : vector<8x128xi1>, vector<8x128xf32>
    %66 = arith.addf %61, %65 : vector<8x128xf32>
    %c16 = arith.constant 16 : index
    %c0_26 = arith.constant 0 : index
    %67 = vector.load %arg2[%c16, %c0_26] : memref<32x128xf32, #tpu.memory_space<vmem>>, vector<8x128xf32>
    %cst_27 = arith.constant 0.000000e+00 : f32
    %68 = vector.broadcast %cst_27 : f32 to vector<8x128xf32>
    %69 = arith.minimumf %67, %68 : vector<8x128xf32>
    %70 = math.absf %67 : vector<8x128xf32>
    %cst_28 = arith.constant 0.000000e+00 : f32
    %71 = vector.broadcast %cst_28 : f32 to vector<8x128xf32>
    %72 = arith.subf %71, %70 : vector<8x128xf32>
    %73 = math.exp %72 : vector<8x128xf32>
    %74 = math.log1p %73 : vector<8x128xf32>
    %75 = arith.subf %69, %74 : vector<8x128xf32>
    %c2_i32 = arith.constant 2 : i32
    %76 = vector.broadcast %c2_i32 : i32 to vector<8x128xi32>
    %77 = arith.cmpi sge, %13, %76 : vector<8x128xi32>
    %cst_29 = arith.constant 0.000000e+00 : f32
    %78 = vector.broadcast %cst_29 : f32 to vector<8x128xf32>
    %79 = arith.subf %78, %75 : vector<8x128xf32>
    %cst_30 = arith.constant 0.000000e+00 : f32
    %80 = vector.broadcast %cst_30 : f32 to vector<8x128xf32>
    %81 = arith.select %77, %79, %80 : vector<8x128xi1>, vector<8x128xf32>
    %82 = arith.addf %66, %81 : vector<8x128xf32>
    %c2_i32_31 = arith.constant 2 : i32
    %83 = vector.broadcast %c2_i32_31 : i32 to vector<8x128xi32>
    %84 = arith.cmpi eq, %13, %83 : vector<8x128xi32>
    %cst_32 = arith.constant 0.000000e+00 : f32
    %85 = vector.broadcast %cst_32 : f32 to vector<8x128xf32>
    %86 = arith.select %84, %67, %85 : vector<8x128xi1>, vector<8x128xf32>
    %87 = arith.addf %82, %86 : vector<8x128xf32>
    %c24 = arith.constant 24 : index
    %c0_33 = arith.constant 0 : index
    %88 = vector.load %arg2[%c24, %c0_33] : memref<32x128xf32, #tpu.memory_space<vmem>>, vector<8x128xf32>
    %cst_34 = arith.constant 0.000000e+00 : f32
    %89 = vector.broadcast %cst_34 : f32 to vector<8x128xf32>
    %90 = arith.minimumf %88, %89 : vector<8x128xf32>
    %91 = math.absf %88 : vector<8x128xf32>
    %cst_35 = arith.constant 0.000000e+00 : f32
    %92 = vector.broadcast %cst_35 : f32 to vector<8x128xf32>
    %93 = arith.subf %92, %91 : vector<8x128xf32>
    %94 = math.exp %93 : vector<8x128xf32>
    %95 = math.log1p %94 : vector<8x128xf32>
    %96 = arith.subf %90, %95 : vector<8x128xf32>
    %c3_i32 = arith.constant 3 : i32
    %97 = vector.broadcast %c3_i32 : i32 to vector<8x128xi32>
    %98 = arith.cmpi sge, %13, %97 : vector<8x128xi32>
    %cst_36 = arith.constant 0.000000e+00 : f32
    %99 = vector.broadcast %cst_36 : f32 to vector<8x128xf32>
    %100 = arith.subf %99, %96 : vector<8x128xf32>
    %cst_37 = arith.constant 0.000000e+00 : f32
    %101 = vector.broadcast %cst_37 : f32 to vector<8x128xf32>
    %102 = arith.select %98, %100, %101 : vector<8x128xi1>, vector<8x128xf32>
    %103 = arith.addf %87, %102 : vector<8x128xf32>
    %c3_i32_38 = arith.constant 3 : i32
    %104 = vector.broadcast %c3_i32_38 : i32 to vector<8x128xi32>
    %105 = arith.cmpi eq, %13, %104 : vector<8x128xi32>
    %cst_39 = arith.constant 0.000000e+00 : f32
    %106 = vector.broadcast %cst_39 : f32 to vector<8x128xf32>
    %107 = arith.select %105, %88, %106 : vector<8x128xi1>, vector<8x128xf32>
    %108 = arith.addf %103, %107 : vector<8x128xf32>
    %c0_40 = arith.constant 0 : index
    %c0_41 = arith.constant 0 : index
    %109 = vector.load %arg5[%c0_40, %c0_41] : memref<8x128xf32, #tpu.memory_space<vmem>>, vector<8x128xf32>
    %110 = arith.addf %109, %108 : vector<8x128xf32>
    %c0_42 = arith.constant 0 : index
    %c0_43 = arith.constant 0 : index
    %111 = vector.load %arg5[%c0_42, %c0_43] : memref<8x128xf32, #tpu.memory_space<vmem>>, vector<8x128xf32>
    tpu.vector_store %arg5[%c0_42, %c0_43], %110 {strides = array<i32>} : memref<8x128xf32, #tpu.memory_space<vmem>>, vector<8x128xf32>,
    %c0_i32_44 = arith.constant 0 : i32
    %112 = arith.cmpi eq, %arg1, %c0_i32_44 : i32
    %113 = arith.extui %112 : i1 to i32
    %c0_i32_45 = arith.constant 0 : i32
    %114 = arith.cmpi ne, %113, %c0_i32_45 : i32
    scf.if %114 {
      %c0_46 = arith.constant 0 : index
      %c0_47 = arith.constant 0 : index
      %115 = vector.load %arg5[%c0_46, %c0_47] : memref<8x128xf32, #tpu.memory_space<vmem>>, vector<8x128xf32>
      %116 = vector.shape_cast %115 : vector<8x128xf32> to vector<1x8x128xf32>
      %cst_48 = arith.constant dense<0.000000e+00> : vector<1xf32>
      %117 = vector.multi_reduction <add>, %116, %cst_48 [1, 2] : vector<1x8x128xf32> to vector<1xf32>
      %118 = vector.shape_cast %117 : vector<1xf32> to vector<1x1x1xf32>
      %119 = vector.extract %118[0, 0, 0] : f32 from vector<1x1x1xf32>
      %c0_49 = arith.constant 0 : index
      %c0_50 = arith.constant 0 : index
      %120 = memref.load %arg4[%c0_49, %c0_50] : memref<1x2xf32, #tpu.memory_space<smem>>
      memref.store %119, %arg4[%c0_49, %c0_50] : memref<1x2xf32, #tpu.memory_space<smem>>
      %c0_51 = arith.constant 0 : index
      %c0_52 = arith.constant 0 : index
      %121 = vector.load %arg6[%c0_51, %c0_52] : memref<8x128xf32, #tpu.memory_space<vmem>>, vector<8x128xf32>
      %122 = vector.shape_cast %121 : vector<8x128xf32> to vector<1x8x128xf32>
      %cst_53 = arith.constant dense<0.000000e+00> : vector<1xf32>
      %123 = vector.multi_reduction <add>, %122, %cst_53 [1, 2] : vector<1x8x128xf32> to vector<1xf32>
      %124 = vector.shape_cast %123 : vector<1xf32> to vector<1x1x1xf32>
      %125 = vector.extract %124[0, 0, 0] : f32 from vector<1x1x1xf32>
      %c0_54 = arith.constant 0 : index
      %c1 = arith.constant 1 : index
      %126 = memref.load %arg4[%c0_54, %c1] : memref<1x2xf32, #tpu.memory_space<smem>>
      memref.store %125, %arg4[%c0_54, %c1] : memref<1x2xf32, #tpu.memory_space<smem>>
    } else {
    }
    return
  }
  func.func @transform_0(%arg0: i32, %arg1: i32) -> (i32, i32) {
    %c1_i32 = arith.constant 1 : i32
    %0 = arith.muli %arg0, %c1_i32 : i32
    %1 = arith.addi %0, %arg1 : i32
    %c0_i32 = arith.constant 0 : i32
    %2 = arith.minsi %1, %c0_i32 : i32
    %c0_i32_0 = arith.constant 0 : i32
    %c0_i32_1 = arith.constant 0 : i32
    return %c0_i32_0, %2 : i32, i32
  }
  func.func @transform_1(%arg0: i32, %arg1: i32) -> (i32, i32) {
    %c1_i32 = arith.constant 1 : i32
    %0 = arith.muli %arg0, %c1_i32 : i32
    %1 = arith.addi %0, %arg1 : i32
    %c0_i32 = arith.constant 0 : i32
    %2 = arith.minsi %1, %c0_i32 : i32
    %c0_i32_0 = arith.constant 0 : i32
    %c0_i32_1 = arith.constant 0 : i32
    return %c0_i32_0, %2 : i32, i32
  }
  func.func @transform_2(%arg0: i32, %arg1: i32) -> (i32, i32) {
    %c0_i32 = arith.constant 0 : i32
    %c0_i32_0 = arith.constant 0 : i32
    return %arg0, %c0_i32 : i32, i32
  }
}

</mosaic_0001>

<bundles_post_ra>
// kernel: tpu_custom_call.1
= control target key start
LH: loop header
LB: loop body
LE: loop exit
PB: predicated region body
PF: predicated region fallthrough
CT: control target
= control target key end

     0   :  { %7 = vsyncpa [#allocation5], 0  ;;  %s366_s0 = inlined_call_operand.hbm [shape: f32[32,128], index: 0, kind: input, shape index: {}]   ;;  %s367_s1 = inlined_call_operand.hbm [shape: s32[8,128], index: 1, kind: input, shape index: {}]   ;;  %s368_s2 = inlined_call_operand.hbm [shape: f32[1,2], index: 2, kind: output, shape index: {}]  }
   0x1   :  { %8 = vsyncpa [#allocation8], 0 }
   0x2   :  { %9 = vsyncpa [#allocation6], 0  ;;  %s298_s9 = smov [#allocation4]  }
   0x3   :  { %s20_s10 = sshll.u32 %s298_s9, 4  ;;  %s21_s10 = int_to_ptr.vmem [resolvable:$true] %s20_s10 }
   0x4   :  { %s252_s11 = scalar_lea.vmem %s21_s10, 512  ;;  %p257_p1 = scmp.lt.s32.totalorder %s21_s10, %s21_s10 }
   0x5   :  { %p253_p0 = scmp.ne.s32.totalorder %s21_s10, %s252_s11  ;;  %p258_p2 = scmp.lt.s32.totalorder %s252_s11, %s252_s11 }
   0x7   :  { %p259_p3 = por %p258_p2, %p257_p1 }
   0x9   :  { %p260_p4 = pnand %p259_p3, %p253_p0 }
   0xb   :  { %263 = shalt.err (!%p260_p4)
}
   0xc   :  { %s299_s12 = smov 128   ;;  %s300_s13 = smov 8  }
   0xd   :  { %26 = dma.hbm_to_vmem [thread:$0]  %s366_s0, 512, %s21_s10, [#allocation5], %s299_s12, %s299_s12, %s300_s13  }
   0xe   :  { %s301_s16 = smov [#allocation7]  }
   0xf   :  { %s38_s17 = sshll.u32 %s301_s16, 4  ;;  %s39_s17 = int_to_ptr.vmem [resolvable:$true] %s38_s17 }
  0x10   :  { %s272_s18 = scalar_lea.vmem %s39_s17, 128  ;;  %p277_p6 = scmp.lt.s32.totalorder %s39_s17, %s39_s17 }
  0x11   :  { %p273_p5 = scmp.ne.s32.totalorder %s39_s17, %s272_s18  ;;  %p278_p7 = scmp.lt.s32.totalorder %s272_s18, %s272_s18 }
  0x13   :  { %p279_p8 = por %p278_p7, %p277_p6 }
  0x15   :  { %p280_p9 = pnand %p279_p8, %p273_p5 }
  0x17   :  { %283 = shalt.err (!%p280_p9)
}
  0x18   :  { %41 = dma.hbm_to_vmem [thread:$0]  %s367_s1, 128, %s39_s17, [#allocation8]  }
  0x19   :  { %292 = dma.done.wait [#allocation5], 512  }
  0x1a   :  { %293 = vsyncadd [#allocation5], 4294966784 }
  0x1b   :  { %294 = dma.done.wait [#allocation8], 128  }
  0x1c   :  { %295 = vsyncadd [#allocation8], 4294967168  ;;  %v324_v0 = vld [vmem:[#allocation4] sm:$0xff]  ;;  %v326_v1 = vld [vmem:[#allocation4 + $0x8] sm:$0xff]  ;;  %v62_v22 = vlaneseq  ;;  %s302_s21 = smov [#allocation9]  }
  0x1d   :  { %v80_v2 = vand.u32 2147483647, %v324_v0  ;;  %v329_v3 = vld [vmem:[#allocation4 + $0x10] sm:$0xff]  ;;  %v103_v4 = vand.u32 2147483647, %v326_v1  ;;  %v332_v5 = vld [vmem:[#allocation4 + $0x18] sm:$0xff] }
  0x1e   :  { %v126_v8 = vand.u32 2147483647, %v329_v3  ;;  %v149_v10 = vand.u32 2147483647, %v332_v5  ;;  %v63_v26 = vand.u32 127, %v62_v22  ;;  %v67_v31 = vld [vmem:[#allocation7] sm:$0xff] }
  0x1f   :  { %v81_v6 = vsub.f32 0.0, %v80_v2  ;;  %v104_v7 = vsub.f32 0.0, %v103_v4  ;;  %v79_v41 = vmin.f32 %v324_v0, 0.0  ;;  %v102_v47 = vmin.f32 %v326_v1, 0.0 }
  0x20   :  { %v127_v12 = vsub.f32 0.0, %v126_v8  ;;  %v150_v13 = vsub.f32 0.0, %v149_v10  ;;  %vm66_vm0 = vcmp.lt.s32.totalorder %v63_v26, 1  ;;  %v125_v50 = vmin.f32 %v329_v3, 0.0 }
  0x21   :  { %v82_v9 = vmul.f32 1.442695, %v81_v6  ;;  %v105_v11 = vmul.f32 1.442695, %v104_v7  ;;  %v68_v36 = vsel %vm66_vm0, %v67_v31, 4294967295  ;;  %v148_v55 = vmin.f32 %v332_v5, 0.0 }
  0x22   :  { %v128_v14 = vmul.f32 1.442695, %v127_v12  ;;  %v151_v15 = vmul.f32 1.442695, %v150_v13  ;;  %vm98_vm3 = vcmp.eq.s32.totalorder %v68_v36, 0  ;;  %vm94_vm6 = vcmp.ge.s32.totalorder %v68_v36, 0 }
  0x23   :  { %228 = vpow2.f32 %v82_v9  ;;  %vm117_vm7 = vcmp.ge.s32.totalorder %v68_v36, 1  ;;  %v99_v2 = vsel %vm98_vm3, %v324_v0, 0.0  ;;  %vm121_vm8 = vcmp.eq.s32.totalorder %v68_v36, 1 }
  0x24   :  { %230 = vpow2.f32 %v105_v11  ;;  %v70_v9 = vadd.s32 1, %v68_v36  ;;  %vm140_vm9 = vcmp.ge.s32.totalorder %v68_v36, 2  ;;  %vm144_vm10 = vcmp.eq.s32.totalorder %v68_v36, 2 }
  0x25   :  { %232 = vpow2.f32 %v128_v14  ;;  %vm163_vm12 = vcmp.ge.s32.totalorder %v68_v36, 3  ;;  %vm167_vm13 = vcmp.eq.s32.totalorder %v68_v36, 3 }
  0x26   :  { %234 = vpow2.f32 %v151_v15  ;;  %v122_v15 = vsel %vm121_vm8, %v326_v1, 0.0  ;;  %vm71_vm11 = vcmp.gt.s32.totalorder %v70_v9, 0 }
  0x30   :  { %v229_v16 = vpop.eup %228 }
  0x31   :  { %v231_v17 = vpop.eup %230  ;;  %v84_v18 = vadd.f32 1.0, %v229_v16  ;;  %v87_v25 = vmul.f32 -0.5, %v229_v16  ;;  %v90_v32 = vand.u32 2147483647, %v229_v16 }
  0x32   :  { %v107_v19 = vadd.f32 1.0, %v231_v17  ;;  %v233_v20 = vpop.eup %232  ;;  %v110_v27 = vmul.f32 -0.5, %v231_v17  ;;  %v113_v34 = vand.u32 2147483647, %v231_v17 }
  0x33   :  { %236 = vlog2.f32 %v84_v18  ;;  %v235_v21 = vpop.eup %234  ;;  %v130_v23 = vadd.f32 1.0, %v233_v20  ;;  %v133_v28 = vmul.f32 -0.5, %v233_v20  ;;  %v88_v29 = vadd.f32 1.0, %v87_v25 }
  0x34   :  { %238 = vlog2.f32 %v107_v19  ;;  %v153_v24 = vadd.f32 1.0, %v235_v21  ;;  %v156_v30 = vmul.f32 -0.5, %v235_v21  ;;  %v111_v33 = vadd.f32 1.0, %v110_v27 }
  0x35   :  { %240 = vlog2.f32 %v130_v23  ;;  %v134_v35 = vadd.f32 1.0, %v133_v28  ;;  %v89_v37 = vmul.f32 %v229_v16, %v88_v29  ;;  %v136_v38 = vand.u32 2147483647, %v233_v20 }
  0x36   :  { %242 = vlog2.f32 %v153_v24  ;;  %v157_v39 = vadd.f32 1.0, %v156_v30  ;;  %vm337_vm1 = vcmp.lt.f32.partialorder %v90_v32, 0.0004427343  ;;  %v112_v43 = vmul.f32 %v231_v17, %v111_v33 }
  0x37   :  { %v159_v44 = vand.u32 2147483647, %v235_v21  ;;  %vm342_vm2 = vcmp.lt.f32.partialorder %v113_v34, 0.0004427343  ;;  %v135_v51 = vmul.f32 %v233_v20, %v134_v35  ;;  %vm349_vm4 = vcmp.lt.f32.partialorder %v136_v38, 0.0004427343 }
  0x38   :  { %v158_v56 = vmul.f32 %v235_v21, %v157_v39  ;;  %v145_v19 = vsel %vm144_vm10, %v329_v3, 0.0  ;;  %v72_v20 = vsel %vm71_vm11, %v70_v9, 0  ;;  %v168_v24 = vsel %vm167_vm13, %v332_v5, 0.0 }
  0x39   :  { %vm160_vm5 = vcmp.lt.f32.partialorder %v159_v44, 0.0004427343  ;;  %vm73_vm14 = vcmp.lt.s32.totalorder %v72_v20, 4 }
  0x3a   :  { %v74_v26 = vsel %vm73_vm14, %v72_v20, 4 }
  0x3b   :  { %v75_v27 = vcvt.s32.f32 %v74_v26 }
  0x40   :  { %v237_v40 = vpop.eup %236 }
  0x41   :  { %v239_v45 = vpop.eup %238  ;;  %v86_v46 = vmul.f32 0.6931472, %v237_v40 }
  0x42   :  { %v109_v49 = vmul.f32 0.6931472, %v239_v45  ;;  %v241_v52 = vpop.eup %240 }
  0x43   :  { %v92_v53 = vsel %vm337_vm1, %v89_v37, %v86_v46  ;;  %v243_v57 = vpop.eup %242  ;;  %v132_v60 = vmul.f32 0.6931472, %v241_v52 }
  0x44   :  { %v93_v58 = vsub.f32 %v79_v41, %v92_v53  ;;  %v115_v59 = vsel %vm342_vm2, %v112_v43, %v109_v49  ;;  %v155_v62 = vmul.f32 0.6931472, %v243_v57 }
  0x45   :  { %v116_v61 = vsub.f32 %v102_v47, %v115_v59  ;;  %v138_v4 = vsel %vm349_vm4, %v135_v51, %v132_v60 }
  0x46   :  { %v95_v63 = vsub.f32 0.0, %v93_v58  ;;  %v139_v7 = vsub.f32 %v125_v50, %v138_v4  ;;  %v161_v8 = vsel %vm160_vm5, %v158_v56, %v155_v62 }
  0x47   :  { %v118_v6 = vsub.f32 0.0, %v116_v61  ;;  %v162_v11 = vsub.f32 %v148_v55, %v161_v8 }
  0x48   :  { %v96_v10 = vsel %vm94_vm6, %v95_v63, 0.0  ;;  %v141_v14 = vsub.f32 0.0, %v139_v7 }
  0x49   :  { %v100_v12 = vadd.f32 %v99_v2, %v96_v10  ;;  %v119_v13 = vsel %vm117_vm7, %v118_v6, 0.0  ;;  %v164_v17 = vsub.f32 0.0, %v162_v11 }
  0x4a   :  { %v142_v0 = vsel %vm140_vm9, %v141_v14, 0.0 }
  0x4b   :  { %v120_v16 = vadd.f32 %v119_v13, %v100_v12  ;;  %v165_v22 = vsel %vm163_vm12, %v164_v17, 0.0 }
  0x4d   :  { %v123_v18 = vadd.f32 %v122_v15, %v120_v16 }
  0x4f   :  { %v143_v21 = vadd.f32 %v142_v0, %v123_v18 }
  0x51   :  { %v146_v23 = vadd.f32 %v145_v19, %v143_v21 }
  0x53   :  { %v166_v25 = vadd.f32 %v165_v22, %v146_v23 }
  0x55   :  { %v169_v1 = vadd.f32 %v168_v24, %v166_v25 }
  0x57   :  { %177 = vadd.xlane.f32.xlu0 %v169_v1 }
  0x5b   :  { %189 = vadd.xlane.f32.xlu0 %v75_v27 }
  0xe0   :  { %v178_v28 = vpop.xlane.xlu0 %177 }
  0xe1   :  { %v179_v29 = vrot.slane %v178_v28, 4 }
  0xe3   :  { %v180_v30 = vadd.f32 %v179_v29, %v178_v28 }
  0xe4   :  { %v190_v31 = vpop.xlane.xlu0 %189 }
  0xe5   :  { %v181_v32 = vrot.slane %v180_v30, 2  ;;  %v191_v3 = vrot.slane %v190_v31, 4 }
  0xe7   :  { %v192_v33 = vadd.f32 %v191_v3, %v190_v31  ;;  %v182_v34 = vadd.f32 %v181_v32, %v180_v30 }
  0xe9   :  { %v193_v35 = vrot.slane %v192_v33, 2  ;;  %v183_v36 = vrot.slane %v182_v34, 1 }
  0xeb   :  { %v194_v37 = vadd.f32 %v193_v35, %v192_v33  ;;  %v184_v38 = vadd.f32 %v183_v36, %v182_v34 }
  0xed   :  { %219 = vpush %v184_v38  ;;  %v195_v5 = vrot.slane %v194_v37, 1 }
  0xef   :  { %v196_v39 = vadd.f32 %v195_v5, %v194_v37 }
  0xf1   :  { %221 = vpush %v196_v39 }
 0x11e   :  { %s220_s0 = spop %219 }
 0x11f   :  { %187 = sst [smem:[#allocation9]] %s220_s0 }
 0x122   :  { %s222_s1 = spop %221 }
 0x123   :  { %199 = sst [smem:[#allocation9 + $0x1]] %s222_s1 }
 0x124   :  { %207 = dma.smem_to_hbm %s302_s21, 16, %s368_s2, [#allocation6]  }
 0x125   :  { %296 = dma.done.wait [#allocation6], 16  }
 0x126   :  { %297 = vsyncadd [#allocation6], 4294967280 }
 0x127   :  { %211 = sfence }
 0x128   :  { %212 = vsyncpa [#allocation5], 1 }
 0x129   :  { %213 = vsyncpa [#allocation8], 1 }
 0x12a   :  { %214 = vsyncpa [#allocation6], 1 }

</bundles_post_ra>
